<compile_context>
chip_gen: v7x
topology: tpu7x:2x2x1
jax: 0.10.0
libtpu: 0.0.40
codegen_flags: <defaults>
</compile_context>

<pallas_src>
import functools

import jax
import jax.numpy as jnp
from jax.experimental import pallas as pl
from jax.experimental.pallas import tpu as pltpu


# ------------------------------- Pallas kernel ------------------------------ #

def _decoder_future_kernel(xcat_ref, h0_ref, wi_ref, bi_ref, whh_ref, bhh_ref,
                           who_ref, bo_ref, out_ref, dec_ref):
    """Fused bidirectional-GRU + output projection.

    xcat_ref : (T*B, 2Z)   row (s*B+b) = [x[s, b, :], x[T-1-s, b, :]]
    h0_ref   : (B, 2H)     initial hidden, [fwd | bwd] per batch row
    wi/bi    : (2Z, 6H)/(1, 6H)  gate-major [r|z|n], dir-minor [fwd|bwd] per gate
    whh/bhh  : (2H, 6H)/(1, 6H)  block-diagonal per gate (fwd rows 0:H, bwd rows H:2H)
    who/bo   : (T*2H, T*F)/(1, T*F)  block-diag hidden_to_output (one block per step)
    out_ref  : (B, T*F)    batch-major prediction (time folded into lanes)
    dec_ref  : (B, T*2H)   VMEM scratch: per-time [fwd|bwd] GRU outputs
    """
    B, H2 = h0_ref.shape
    H = H2 // 2
    T = xcat_ref.shape[0] // B

    dot = functools.partial(jnp.dot, preferred_element_type=jnp.float32)

    # ---- hoisted recurrent weight / bias loads (loop below is fully unrolled) ----
    whh = whh_ref[...]                                              # (2H, 6H)
    bhh = bhh_ref[...]                                              # (1, 6H)

    # ---- hoisted input projection: one GEMM for all timesteps & both directions ----
    ix = dot(xcat_ref[...], wi_ref[...]) + bi_ref[...]              # (T*B, 6H)

    # ---- serial GRU recurrence (both directions at once), fully unrolled ----
    h = h0_ref[...]                                                 # (B, 2H)
    for s in range(T):
        g = ix[s * B:(s + 1) * B]                                   # (B, 6H) static slice
        hh = dot(h, whh) + bhh                                      # (B, 6H)
        # r & z gates fused: one sigmoid over an aligned 4H-lane tile.
        rz = jax.nn.sigmoid(g[:, :2 * H2] + hh[:, :2 * H2])         # (B, 4H)
        r, zg = rz[:, :H2], rz[:, H2:2 * H2]
        n = jnp.tanh(g[:, 2 * H2:3 * H2] + r * hh[:, 2 * H2:3 * H2])
        h = (1.0 - zg) * n + zg * h                                 # (B, 2H)
        # Stash outputs time-folded into lanes (static slices, VMEM scratch).
        dec_ref[:, s * H2:s * H2 + H] = h[:, :H]                    # fwd out @ time s
        dec_ref[:, (T - 1 - s) * H2 + H:(T - s) * H2] = h[:, H:H2]  # bwd out @ time T-1-s

    # ---- fused output projection: ONE GEMM against block-diagonal weight ----
    out_ref[...] = dot(dec_ref[...], who_ref[...]) + bo_ref[...]    # (B, T*F)


# --------------------------------- wrapper ---------------------------------- #

def decoder_future_forward(params, inputs, z, *, future_steps):
    """inputs: (B, seq_len, Z) batch-first, z: (B, Z) -> prediction (B, future_steps, F)."""
    B, _, Z = inputs.shape
    T = future_steps
    H2 = params['whh'].shape[0]                                     # 2H
    H = H2 // 2
    F = params['who_big'].shape[1] // T

    # Time-major inputs with the backward-direction reversal baked into the layout.
    x = jnp.transpose(inputs[:, :T, :], (1, 0, 2))                  # (T, B, Z)
    xcat = jnp.concatenate([x, x[::-1]], axis=-1).reshape(T * B, 2 * Z)

    # latent_to_hidden + PyTorch `.view(2, B, H)` batch-mixing reshuffle (tiny; done
    # in XLA so the kernel receives the initial state already packed as [fwd|bwd]).
    hid = z @ params['wl2h'] + params['bl2h']                       # (B, 2H)
    h0 = hid.reshape(2, B, H).transpose(1, 0, 2).reshape(B, H2)     # (B, 2H)

    out = pl.pallas_call(
        _decoder_future_kernel,
        out_shape=jax.ShapeDtypeStruct((B, T * F), jnp.float32),
        scratch_shapes=[pltpu.VMEM((B, T * H2), jnp.float32)],
    )(xcat, h0, params['wi'], params['bi'], params['whh'], params['bhh'],
      params['who_big'], params['bo_big'])

    return out.reshape(B, T, F)                                     # no transpose needed


# ----------------------------- parameter set-up ------------------------------ #

def _uniform(key, shape, scale):
    return jax.random.uniform(key, shape, jnp.float32, -scale, scale)


def init_decoder_future_params(key, zdims, num_features, hidden_size_pred):
    """Raw per-direction parameters; gate order [r, z, n] (PyTorch GRU convention)."""
    Z, F, H = zdims, num_features, hidden_size_pred
    ks = jax.random.split(key, 12)
    sH, sZ, s2H = 1.0 / H ** 0.5, 1.0 / Z ** 0.5, 1.0 / (2 * H) ** 0.5
    return dict(
        wl2h=_uniform(ks[0], (Z, 2 * H), sZ), bl2h=_uniform(ks[1], (1, 2 * H), sZ),
        wi_f=_uniform(ks[2], (Z, 3 * H), sH), wh_f=_uniform(ks[3], (H, 3 * H), sH),
        bi_f=_uniform(ks[4], (3 * H,), sH), bh_f=_uniform(ks[5], (3 * H,), sH),
        wi_b=_uniform(ks[6], (Z, 3 * H), sH), wh_b=_uniform(ks[7], (H, 3 * H), sH),
        bi_b=_uniform(ks[8], (3 * H,), sH), bh_b=_uniform(ks[9], (3 * H,), sH),
        who=_uniform(ks[10], (2 * H, F), s2H), bo=_uniform(ks[11], (1, F), s2H),
    )


def _fuse_gate_weights(wf, wb, H):
    """Block-diagonal fuse of the two directions, gate-major / direction-minor columns."""
    zf = jnp.zeros((wf.shape[0], H), wf.dtype)
    zb = jnp.zeros((wb.shape[0], H), wb.dtype)
    cols = []
    for g in range(3):
        top = jnp.concatenate([wf[:, g * H:(g + 1) * H], zf], axis=1)
        bot = jnp.concatenate([zb, wb[:, g * H:(g + 1) * H]], axis=1)
        cols.append(jnp.concatenate([top, bot], axis=0))
    return jnp.concatenate(cols, axis=1)                            # (din_f+din_b, 6H)


def _fuse_gate_bias(bf, bb, H):
    return jnp.concatenate(
        [jnp.concatenate([bf[g * H:(g + 1) * H], bb[g * H:(g + 1) * H]]) for g in range(3)]
    ).reshape(1, 6 * H)


def fuse_decoder_future_params(raw, H, future_steps):
    T = future_steps
    # Block-diagonal output projection: one `who` block per future step so the
    # kernel epilogue is a single GEMM producing the batch-major (B, T*F) output.
    who_big = jnp.kron(jnp.eye(T, dtype=raw['who'].dtype), raw['who'])  # (T*2H, T*F)
    bo_big = jnp.tile(raw['bo'], (1, T))                                # (1, T*F)
    return dict(
        wl2h=raw['wl2h'], bl2h=raw['bl2h'],
        wi=_fuse_gate_weights(raw['wi_f'], raw['wi_b'], H),
        bi=_fuse_gate_bias(raw['bi_f'], raw['bi_b'], H),
        whh=_fuse_gate_weights(raw['wh_f'], raw['wh_b'], H),
        bhh=_fuse_gate_bias(raw['bh_f'], raw['bh_b'], H),
        who_big=who_big, bo_big=bo_big,
    )


# ------------------------- plain-JAX reference check ------------------------- #

def decoder_future_reference(raw, inputs, z, future_steps, H):
    B, _, _ = inputs.shape
    T = future_steps
    x = inputs[:, :T, :]
    hid = z @ raw['wl2h'] + raw['bl2h']                             # (B, 2H)
    hidden = hid.reshape(2, B, H)                                   # torch .view semantics
    h_f, h_b = hidden[0], hidden[1]

    def cell(h, xt, wi, wh, bi, bh):
        gi = xt @ wi + bi
        gh = h @ wh + bh
        r = jax.nn.sigmoid(gi[:, :H] + gh[:, :H])
        zz = jax.nn.sigmoid(gi[:, H:2 * H] + gh[:, H:2 * H])
        n = jnp.tanh(gi[:, 2 * H:] + r * gh[:, 2 * H:])
        return (1.0 - zz) * n + zz * h

    out_f, h = [], h_f
    for t in range(T):
        h = cell(h, x[:, t, :], raw['wi_f'], raw['wh_f'], raw['bi_f'], raw['bh_f'])
        out_f.append(h)
    out_b, h = [None] * T, h_b
    for t in range(T - 1, -1, -1):
        h = cell(h, x[:, t, :], raw['wi_b'], raw['wh_b'], raw['bi_b'], raw['bh_b'])
        out_b[t] = h
    dec = jnp.concatenate([jnp.stack(out_f, 1), jnp.stack(out_b, 1)], axis=-1)   # (B,T,2H)
    return dec @ raw['who'] + raw['bo']


# ----------------------------------- main ------------------------------------ #

if __name__ == "__main__":
    TEMPORAL_WINDOW = 16
    ZDIMS = 16
    NUM_FEATURES = 12
    FUTURE_STEPS = 4
    HIDDEN_SIZE_PRED = 32
    B = 2
    seq_len = TEMPORAL_WINDOW // 2
    # Note: nn.GRU dropout is a no-op with num_layers=1, so eval/train forward coincide.

    key = jax.random.PRNGKey(0)
    kp, kx, kz = jax.random.split(key, 3)
    raw = init_decoder_future_params(kp, ZDIMS, NUM_FEATURES, HIDDEN_SIZE_PRED)
    fused = fuse_decoder_future_params(raw, HIDDEN_SIZE_PRED, FUTURE_STEPS)

    inputs = jax.random.normal(kx, (B, seq_len, ZDIMS), jnp.float32)
    z = jax.random.normal(kz, (B, ZDIMS), jnp.float32)

    fwd = jax.jit(functools.partial(decoder_future_forward, future_steps=FUTURE_STEPS))
    prediction = jax.block_until_ready(fwd(fused, inputs, z))

    assert prediction.shape == (B, FUTURE_STEPS, NUM_FEATURES)
    assert bool(jnp.all(jnp.isfinite(prediction)))

    reference = decoder_future_reference(raw, inputs, z, FUTURE_STEPS, HIDDEN_SIZE_PRED)
    max_err = float(jnp.max(jnp.abs(prediction - reference)))
    assert bool(jnp.allclose(prediction, reference, rtol=2e-3, atol=2e-3)), max_err

    print("KERNEL_OK")
</pallas_src>

<mosaic_0001>
module attributes {stable_mosaic.version = 11 : i64} {
  func.func @_decoder_future_kernel(%arg0: memref<8x32xf32, #tpu.memory_space<vmem>>, %arg1: memref<2x64xf32, #tpu.memory_space<vmem>>, %arg2: memref<32x192xf32, #tpu.memory_space<vmem>>, %arg3: memref<1x192xf32, #tpu.memory_space<vmem>>, %arg4: memref<64x192xf32, #tpu.memory_space<vmem>>, %arg5: memref<1x192xf32, #tpu.memory_space<vmem>>, %arg6: memref<256x48xf32, #tpu.memory_space<vmem>>, %arg7: memref<1x48xf32, #tpu.memory_space<vmem>>, %arg8: memref<2x48xf32, #tpu.memory_space<vmem>>, %arg9: memref<2x256xf32, #tpu.memory_space<vmem>>) attributes {dimension_semantics = [], scalar_prefetch = 0 : i64, scratch_operands = 1 : i64, tpu.core_type = #tpu.core_type<tc>} {
    %c0 = arith.constant 0 : index
    %c0_0 = arith.constant 0 : index
    %0 = vector.load %arg4[%c0, %c0_0] : memref<64x192xf32, #tpu.memory_space<vmem>>, vector<64x192xf32>
    %c0_1 = arith.constant 0 : index
    %c0_2 = arith.constant 0 : index
    %1 = vector.load %arg5[%c0_1, %c0_2] : memref<1x192xf32, #tpu.memory_space<vmem>>, vector<1x192xf32>
    %c0_3 = arith.constant 0 : index
    %c0_4 = arith.constant 0 : index
    %2 = vector.load %arg0[%c0_3, %c0_4] : memref<8x32xf32, #tpu.memory_space<vmem>>, vector<8x32xf32>
    %c0_5 = arith.constant 0 : index
    %c0_6 = arith.constant 0 : index
    %3 = vector.load %arg2[%c0_5, %c0_6] : memref<32x192xf32, #tpu.memory_space<vmem>>, vector<32x192xf32>
    %cst = arith.constant dense<0.000000e+00> : vector<8x192xf32>
    %4 = tpu.matmul %2, %3, %cst {dimension_numbers = #tpu.dot_dimension_numbers<[1], [0], [0], [1], [0, 0, 1, 1], [], []>} : vector<8x32xf32>, vector<32x192xf32>, vector<8x192xf32> -> vector<8x192xf32>
    %c0_7 = arith.constant 0 : index
    %c0_8 = arith.constant 0 : index
    %5 = vector.load %arg3[%c0_7, %c0_8] : memref<1x192xf32, #tpu.memory_space<vmem>>, vector<1x192xf32>
    %6 = vector.broadcast %5 : vector<1x192xf32> to vector<8x192xf32>
    %7 = arith.addf %4, %6 : vector<8x192xf32>
    %c0_9 = arith.constant 0 : index
    %c0_10 = arith.constant 0 : index
    %8 = vector.load %arg1[%c0_9, %c0_10] : memref<2x64xf32, #tpu.memory_space<vmem>>, vector<2x64xf32>
    %9 = vector.extract_strided_slice %7 {offsets = [0, 0], sizes = [2, 192], strides = [1, 1]} : vector<8x192xf32> to vector<2x192xf32>
    %cst_11 = arith.constant dense<0.000000e+00> : vector<2x192xf32>
    %10 = tpu.matmul %8, %0, %cst_11 {dimension_numbers = #tpu.dot_dimension_numbers<[1], [0], [0], [1], [0, 0, 1, 1], [], []>} : vector<2x64xf32>, vector<64x192xf32>, vector<2x192xf32> -> vector<2x192xf32>
    %11 = vector.broadcast %1 : vector<1x192xf32> to vector<2x192xf32>
    %12 = arith.addf %10, %11 : vector<2x192xf32>
    %13 = vector.extract_strided_slice %9 {offsets = [0, 0], sizes = [2, 128], strides = [1, 1]} : vector<2x192xf32> to vector<2x128xf32>
    %14 = vector.extract_strided_slice %12 {offsets = [0, 0], sizes = [2, 128], strides = [1, 1]} : vector<2x192xf32> to vector<2x128xf32>
    %15 = arith.addf %13, %14 : vector<2x128xf32>
    %16 = arith.negf %15 : vector<2x128xf32>
    %17 = math.exp %16 : vector<2x128xf32>
    %cst_12 = arith.constant 1.000000e+00 : f32
    %18 = vector.broadcast %cst_12 : f32 to vector<2x128xf32>
    %19 = arith.addf %18, %17 : vector<2x128xf32>
    %20 = arith.divf %18, %19 : vector<2x128xf32>
    %21 = vector.extract_strided_slice %20 {offsets = [0, 0], sizes = [2, 64], strides = [1, 1]} : vector<2x128xf32> to vector<2x64xf32>
    %22 = vector.extract_strided_slice %20 {offsets = [0, 64], sizes = [2, 64], strides = [1, 1]} : vector<2x128xf32> to vector<2x64xf32>
    %23 = vector.extract_strided_slice %9 {offsets = [0, 128], sizes = [2, 64], strides = [1, 1]} : vector<2x192xf32> to vector<2x64xf32>
    %24 = vector.extract_strided_slice %12 {offsets = [0, 128], sizes = [2, 64], strides = [1, 1]} : vector<2x192xf32> to vector<2x64xf32>
    %25 = arith.mulf %21, %24 : vector<2x64xf32>
    %26 = arith.addf %23, %25 : vector<2x64xf32>
    %27 = math.tanh %26 : vector<2x64xf32>
    %cst_13 = arith.constant 1.000000e+00 : f32
    %28 = vector.broadcast %cst_13 : f32 to vector<2x64xf32>
    %29 = arith.subf %28, %22 : vector<2x64xf32>
    %30 = arith.mulf %29, %27 : vector<2x64xf32>
    %31 = arith.mulf %22, %8 : vector<2x64xf32>
    %32 = arith.addf %30, %31 : vector<2x64xf32>
    %33 = vector.extract_strided_slice %32 {offsets = [0, 0], sizes = [2, 32], strides = [1, 1]} : vector<2x64xf32> to vector<2x32xf32>
    %c0_14 = arith.constant 0 : index
    %c0_15 = arith.constant 0 : index
    %34 = vector.load %arg9[%c0_14, %c0_15] : memref<2x256xf32, #tpu.memory_space<vmem>>, vector<2x32xf32>
    tpu.vector_store %arg9[%c0_14, %c0_15], %33 {strides = array<i32>} : memref<2x256xf32, #tpu.memory_space<vmem>>, vector<2x32xf32>,
    %35 = vector.extract_strided_slice %32 {offsets = [0, 32], sizes = [2, 32], strides = [1, 1]} : vector<2x64xf32> to vector<2x32xf32>
    %c0_16 = arith.constant 0 : index
    %c224 = arith.constant 224 : index
    %36 = vector.load %arg9[%c0_16, %c224] : memref<2x256xf32, #tpu.memory_space<vmem>>, vector<2x32xf32>
    tpu.vector_store %arg9[%c0_16, %c224], %35 {strides = array<i32>} : memref<2x256xf32, #tpu.memory_space<vmem>>, vector<2x32xf32>,
    %37 = vector.extract_strided_slice %7 {offsets = [2, 0], sizes = [2, 192], strides = [1, 1]} : vector<8x192xf32> to vector<2x192xf32>
    %cst_17 = arith.constant dense<0.000000e+00> : vector<2x192xf32>
    %38 = tpu.matmul %32, %0, %cst_17 {dimension_numbers = #tpu.dot_dimension_numbers<[1], [0], [0], [1], [0, 0, 1, 1], [], []>} : vector<2x64xf32>, vector<64x192xf32>, vector<2x192xf32> -> vector<2x192xf32>
    %39 = vector.broadcast %1 : vector<1x192xf32> to vector<2x192xf32>
    %40 = arith.addf %38, %39 : vector<2x192xf32>
    %41 = vector.extract_strided_slice %37 {offsets = [0, 0], sizes = [2, 128], strides = [1, 1]} : vector<2x192xf32> to vector<2x128xf32>
    %42 = vector.extract_strided_slice %40 {offsets = [0, 0], sizes = [2, 128], strides = [1, 1]} : vector<2x192xf32> to vector<2x128xf32>
    %43 = arith.addf %41, %42 : vector<2x128xf32>
    %44 = arith.negf %43 : vector<2x128xf32>
    %45 = math.exp %44 : vector<2x128xf32>
    %cst_18 = arith.constant 1.000000e+00 : f32
    %46 = vector.broadcast %cst_18 : f32 to vector<2x128xf32>
    %47 = arith.addf %46, %45 : vector<2x128xf32>
    %48 = arith.divf %46, %47 : vector<2x128xf32>
    %49 = vector.extract_strided_slice %48 {offsets = [0, 0], sizes = [2, 64], strides = [1, 1]} : vector<2x128xf32> to vector<2x64xf32>
    %50 = vector.extract_strided_slice %48 {offsets = [0, 64], sizes = [2, 64], strides = [1, 1]} : vector<2x128xf32> to vector<2x64xf32>
    %51 = vector.extract_strided_slice %37 {offsets = [0, 128], sizes = [2, 64], strides = [1, 1]} : vector<2x192xf32> to vector<2x64xf32>
    %52 = vector.extract_strided_slice %40 {offsets = [0, 128], sizes = [2, 64], strides = [1, 1]} : vector<2x192xf32> to vector<2x64xf32>
    %53 = arith.mulf %49, %52 : vector<2x64xf32>
    %54 = arith.addf %51, %53 : vector<2x64xf32>
    %55 = math.tanh %54 : vector<2x64xf32>
    %cst_19 = arith.constant 1.000000e+00 : f32
    %56 = vector.broadcast %cst_19 : f32 to vector<2x64xf32>
    %57 = arith.subf %56, %50 : vector<2x64xf32>
    %58 = arith.mulf %57, %55 : vector<2x64xf32>
    %59 = arith.mulf %50, %32 : vector<2x64xf32>
    %60 = arith.addf %58, %59 : vector<2x64xf32>
    %61 = vector.extract_strided_slice %60 {offsets = [0, 0], sizes = [2, 32], strides = [1, 1]} : vector<2x64xf32> to vector<2x32xf32>
    %c0_20 = arith.constant 0 : index
    %c64 = arith.constant 64 : index
    %62 = vector.load %arg9[%c0_20, %c64] : memref<2x256xf32, #tpu.memory_space<vmem>>, vector<2x32xf32>
    tpu.vector_store %arg9[%c0_20, %c64], %61 {strides = array<i32>} : memref<2x256xf32, #tpu.memory_space<vmem>>, vector<2x32xf32>,
    %63 = vector.extract_strided_slice %60 {offsets = [0, 32], sizes = [2, 32], strides = [1, 1]} : vector<2x64xf32> to vector<2x32xf32>
    %c0_21 = arith.constant 0 : index
    %c160 = arith.constant 160 : index
    %64 = vector.load %arg9[%c0_21, %c160] : memref<2x256xf32, #tpu.memory_space<vmem>>, vector<2x32xf32>
    tpu.vector_store %arg9[%c0_21, %c160], %63 {strides = array<i32>} : memref<2x256xf32, #tpu.memory_space<vmem>>, vector<2x32xf32>,
    %65 = vector.extract_strided_slice %7 {offsets = [4, 0], sizes = [2, 192], strides = [1, 1]} : vector<8x192xf32> to vector<2x192xf32>
    %cst_22 = arith.constant dense<0.000000e+00> : vector<2x192xf32>
    %66 = tpu.matmul %60, %0, %cst_22 {dimension_numbers = #tpu.dot_dimension_numbers<[1], [0], [0], [1], [0, 0, 1, 1], [], []>} : vector<2x64xf32>, vector<64x192xf32>, vector<2x192xf32> -> vector<2x192xf32>
    %67 = vector.broadcast %1 : vector<1x192xf32> to vector<2x192xf32>
    %68 = arith.addf %66, %67 : vector<2x192xf32>
    %69 = vector.extract_strided_slice %65 {offsets = [0, 0], sizes = [2, 128], strides = [1, 1]} : vector<2x192xf32> to vector<2x128xf32>
    %70 = vector.extract_strided_slice %68 {offsets = [0, 0], sizes = [2, 128], strides = [1, 1]} : vector<2x192xf32> to vector<2x128xf32>
    %71 = arith.addf %69, %70 : vector<2x128xf32>
    %72 = arith.negf %71 : vector<2x128xf32>
    %73 = math.exp %72 : vector<2x128xf32>
    %cst_23 = arith.constant 1.000000e+00 : f32
    %74 = vector.broadcast %cst_23 : f32 to vector<2x128xf32>
    %75 = arith.addf %74, %73 : vector<2x128xf32>
    %76 = arith.divf %74, %75 : vector<2x128xf32>
    %77 = vector.extract_strided_slice %76 {offsets = [0, 0], sizes = [2, 64], strides = [1, 1]} : vector<2x128xf32> to vector<2x64xf32>
    %78 = vector.extract_strided_slice %76 {offsets = [0, 64], sizes = [2, 64], strides = [1, 1]} : vector<2x128xf32> to vector<2x64xf32>
    %79 = vector.extract_strided_slice %65 {offsets = [0, 128], sizes = [2, 64], strides = [1, 1]} : vector<2x192xf32> to vector<2x64xf32>
    %80 = vector.extract_strided_slice %68 {offsets = [0, 128], sizes = [2, 64], strides = [1, 1]} : vector<2x192xf32> to vector<2x64xf32>
    %81 = arith.mulf %77, %80 : vector<2x64xf32>
    %82 = arith.addf %79, %81 : vector<2x64xf32>
    %83 = math.tanh %82 : vector<2x64xf32>
    %cst_24 = arith.constant 1.000000e+00 : f32
    %84 = vector.broadcast %cst_24 : f32 to vector<2x64xf32>
    %85 = arith.subf %84, %78 : vector<2x64xf32>
    %86 = arith.mulf %85, %83 : vector<2x64xf32>
    %87 = arith.mulf %78, %60 : vector<2x64xf32>
    %88 = arith.addf %86, %87 : vector<2x64xf32>
    %89 = vector.extract_strided_slice %88 {offsets = [0, 0], sizes = [2, 32], strides = [1, 1]} : vector<2x64xf32> to vector<2x32xf32>
    %c0_25 = arith.constant 0 : index
    %c128 = arith.constant 128 : index
    %90 = vector.load %arg9[%c0_25, %c128] : memref<2x256xf32, #tpu.memory_space<vmem>>, vector<2x32xf32>
    tpu.vector_store %arg9[%c0_25, %c128], %89 {strides = array<i32>} : memref<2x256xf32, #tpu.memory_space<vmem>>, vector<2x32xf32>,
    %91 = vector.extract_strided_slice %88 {offsets = [0, 32], sizes = [2, 32], strides = [1, 1]} : vector<2x64xf32> to vector<2x32xf32>
    %c0_26 = arith.constant 0 : index
    %c96 = arith.constant 96 : index
    %92 = vector.load %arg9[%c0_26, %c96] : memref<2x256xf32, #tpu.memory_space<vmem>>, vector<2x32xf32>
    tpu.vector_store %arg9[%c0_26, %c96], %91 {strides = array<i32>} : memref<2x256xf32, #tpu.memory_space<vmem>>, vector<2x32xf32>,
    %93 = vector.extract_strided_slice %7 {offsets = [6, 0], sizes = [2, 192], strides = [1, 1]} : vector<8x192xf32> to vector<2x192xf32>
    %cst_27 = arith.constant dense<0.000000e+00> : vector<2x192xf32>
    %94 = tpu.matmul %88, %0, %cst_27 {dimension_numbers = #tpu.dot_dimension_numbers<[1], [0], [0], [1], [0, 0, 1, 1], [], []>} : vector<2x64xf32>, vector<64x192xf32>, vector<2x192xf32> -> vector<2x192xf32>
    %95 = vector.broadcast %1 : vector<1x192xf32> to vector<2x192xf32>
    %96 = arith.addf %94, %95 : vector<2x192xf32>
    %97 = vector.extract_strided_slice %93 {offsets = [0, 0], sizes = [2, 128], strides = [1, 1]} : vector<2x192xf32> to vector<2x128xf32>
    %98 = vector.extract_strided_slice %96 {offsets = [0, 0], sizes = [2, 128], strides = [1, 1]} : vector<2x192xf32> to vector<2x128xf32>
    %99 = arith.addf %97, %98 : vector<2x128xf32>
    %100 = arith.negf %99 : vector<2x128xf32>
    %101 = math.exp %100 : vector<2x128xf32>
    %cst_28 = arith.constant 1.000000e+00 : f32
    %102 = vector.broadcast %cst_28 : f32 to vector<2x128xf32>
    %103 = arith.addf %102, %101 : vector<2x128xf32>
    %104 = arith.divf %102, %103 : vector<2x128xf32>
    %105 = vector.extract_strided_slice %104 {offsets = [0, 0], sizes = [2, 64], strides = [1, 1]} : vector<2x128xf32> to vector<2x64xf32>
    %106 = vector.extract_strided_slice %104 {offsets = [0, 64], sizes = [2, 64], strides = [1, 1]} : vector<2x128xf32> to vector<2x64xf32>
    %107 = vector.extract_strided_slice %93 {offsets = [0, 128], sizes = [2, 64], strides = [1, 1]} : vector<2x192xf32> to vector<2x64xf32>
    %108 = vector.extract_strided_slice %96 {offsets = [0, 128], sizes = [2, 64], strides = [1, 1]} : vector<2x192xf32> to vector<2x64xf32>
    %109 = arith.mulf %105, %108 : vector<2x64xf32>
    %110 = arith.addf %107, %109 : vector<2x64xf32>
    %111 = math.tanh %110 : vector<2x64xf32>
    %cst_29 = arith.constant 1.000000e+00 : f32
    %112 = vector.broadcast %cst_29 : f32 to vector<2x64xf32>
    %113 = arith.subf %112, %106 : vector<2x64xf32>
    %114 = arith.mulf %113, %111 : vector<2x64xf32>
    %115 = arith.mulf %106, %88 : vector<2x64xf32>
    %116 = arith.addf %114, %115 : vector<2x64xf32>
    %117 = vector.extract_strided_slice %116 {offsets = [0, 0], sizes = [2, 32], strides = [1, 1]} : vector<2x64xf32> to vector<2x32xf32>
    %c0_30 = arith.constant 0 : index
    %c192 = arith.constant 192 : index
    %118 = vector.load %arg9[%c0_30, %c192] : memref<2x256xf32, #tpu.memory_space<vmem>>, vector<2x32xf32>
    tpu.vector_store %arg9[%c0_30, %c192], %117 {strides = array<i32>} : memref<2x256xf32, #tpu.memory_space<vmem>>, vector<2x32xf32>,
    %119 = vector.extract_strided_slice %116 {offsets = [0, 32], sizes = [2, 32], strides = [1, 1]} : vector<2x64xf32> to vector<2x32xf32>
    %c0_31 = arith.constant 0 : index
    %c32 = arith.constant 32 : index
    %120 = vector.load %arg9[%c0_31, %c32] : memref<2x256xf32, #tpu.memory_space<vmem>>, vector<2x32xf32>
    tpu.vector_store %arg9[%c0_31, %c32], %119 {strides = array<i32>} : memref<2x256xf32, #tpu.memory_space<vmem>>, vector<2x32xf32>,
    %c0_32 = arith.constant 0 : index
    %c0_33 = arith.constant 0 : index
    %121 = vector.load %arg9[%c0_32, %c0_33] : memref<2x256xf32, #tpu.memory_space<vmem>>, vector<2x256xf32>
    %c0_34 = arith.constant 0 : index
    %c0_35 = arith.constant 0 : index
    %122 = vector.load %arg6[%c0_34, %c0_35] : memref<256x48xf32, #tpu.memory_space<vmem>>, vector<256x48xf32>
    %cst_36 = arith.constant dense<0.000000e+00> : vector<2x48xf32>
    %123 = tpu.matmul %121, %122, %cst_36 {dimension_numbers = #tpu.dot_dimension_numbers<[1], [0], [0], [1], [0, 0, 1, 1], [], []>} : vector<2x256xf32>, vector<256x48xf32>, vector<2x48xf32> -> vector<2x48xf32>
    %c0_37 = arith.constant 0 : index
    %c0_38 = arith.constant 0 : index
    %124 = vector.load %arg7[%c0_37, %c0_38] : memref<1x48xf32, #tpu.memory_space<vmem>>, vector<1x48xf32>
    %125 = vector.broadcast %124 : vector<1x48xf32> to vector<2x48xf32>
    %126 = arith.addf %123, %125 : vector<2x48xf32>
    %c0_39 = arith.constant 0 : index
    %c0_40 = arith.constant 0 : index
    %127 = vector.load %arg8[%c0_39, %c0_40] : memref<2x48xf32, #tpu.memory_space<vmem>>, vector<2x48xf32>
    tpu.vector_store %arg8[%c0_39, %c0_40], %126 {strides = array<i32>} : memref<2x48xf32, #tpu.memory_space<vmem>>, vector<2x48xf32>,
    return
  }
}

</mosaic_0001>

<bundles_post_ra>
// kernel: decoder_future_forward.1
= control target key start
LH: loop header
LB: loop body
LE: loop exit
PB: predicated region body
PF: predicated region fallthrough
CT: control target
= control target key end

     0   :  { %v922_v3 = vmov 0.0   ;;  %vm67_vm0 = vcmask 261120   ;;  %vm154_vm1 = vcmask 523264   ;;  %v57_v40 = vlaneseq  ;;  %s1276_s2 = inlined_call_operand.vmem [shape: f32[32,192], index: 2, kind: input, shape index: {}]   ;;  %s1277_s4 = inlined_call_operand.vmem [shape: f32[64,192], index: 4, kind: input, shape index: {}]   ;;  %s1278_s0 = inlined_call_operand.vmem [shape: f32[8,32], index: 0, kind: input, shape index: {}]   ;;  %s1279_s1 = inlined_call_operand.vmem [shape: f32[2,64], index: 1, kind: input, shape index: {}]   ;;  %s1280_s3 = inlined_call_operand.vmem [shape: f32[1,192], index: 3, kind: input, shape index: {}]   ;;  %s1281_s5 = inlined_call_operand.vmem [shape: f32[1,192], index: 5, kind: input, shape index: {}]   ;;  %s1282_s6 = inlined_call_operand.vmem [shape: f32[256,48], index: 6, kind: input, shape index: {}]   ;;  %s1283_s7 = inlined_call_operand.vmem [shape: f32[1,48], index: 7, kind: input, shape index: {}]   ;;  %s1284_s8 = inlined_call_operand.vmem [shape: f32[2,48], index: 8, kind: output, shape index: {}]  }
   0x1   :  { %v48_v0 = vld [vmem:[%s1276_s2 + $0x8] sm:$0xff]  ;;  %v50_v1 = vld [vmem:[%s1276_s2 + $0x18] sm:$0xff]  ;;  %v47_v2 = vld [vmem:[%s1276_s2] sm:$0xff]  ;;  %135 = vmatprep.mubr.f32.mxu0 %v922_v3  ;;  %452 = vmatprep.mubr.f32.mxu1 %v922_v3  ;;  %vm263_vm2 = vcmask 1042176   ;;  %vm261_vm3 = vcmask 254976   ;;  %vm376_vm4 = vcmask 779776  }
   0x2   :  { %v791_v4 = vpack.c.bf16 %v50_v1, %v48_v0  ;;  %v49_v5 = vld [vmem:[%s1276_s2 + $0x10] sm:$0xff]  ;;  %v52_v6 = vld [vmem:[%s1276_s2 + $0x28] sm:$0xff]  ;;  %v54_v7 = vld [vmem:[%s1276_s2 + $0x38] sm:$0xff]  ;;  %v1088_v42 = vshrl.u32 %v57_v40, 7  ;;  %vm381_vm5 = vcmask 517376   ;;  %vm739_vm6 = vcmask 386048  }
   0x3   :  { %v793_v8 = vpack.c.bf16 %v49_v5, %v47_v2  ;;  %v795_v9 = vpack.c.bf16 %v54_v7, %v52_v6  ;;  %v51_v10 = vld [vmem:[%s1276_s2 + $0x20] sm:$0xff]  ;;  %v53_v11 = vld [vmem:[%s1276_s2 + $0x30] sm:$0xff]  ;;  %v30_v12 = vld [vmem:[%s1277_s4 + $0x8] sm:$0xff] }
   0x4   :  { %792 = vmatprep.subr.bf16.mxu0 %v791_v4  ;;  %v32_v13 = vld [vmem:[%s1277_s4 + $0x18] sm:$0xff]  ;;  %v29_v14 = vld [vmem:[%s1277_s4] sm:$0xff]  ;;  %v797_v15 = vpack.c.bf16 %v53_v11, %v51_v10  ;;  %v31_v17 = vld [vmem:[%s1277_s4 + $0x10] sm:$0xff]  ;;  %v59_v43 = vsub.s32 0, %v1088_v42  ;;  %v63_v56 = vsub.s32 1, %v1088_v42 }
   0x5   :  { %794 = vmatpush1.bf16.msra.mxu0 %v793_v8  ;;  %v799_v16 = vpack.c.bf16 %v32_v13, %v30_v12  ;;  %v34_v18 = vld [vmem:[%s1277_s4 + $0x28] sm:$0xff]  ;;  %v36_v19 = vld [vmem:[%s1277_s4 + $0x38] sm:$0xff]  ;;  %v1014_v20 = vpack.c.bf16 %v31_v17, %v29_v14  ;;  %v33_v22 = vld [vmem:[%s1277_s4 + $0x20] sm:$0xff] }
   0x6   :  { %796 = vmatprep.subr.bf16.mxu0 %v795_v9  ;;  %v1016_v21 = vpack.c.bf16 %v36_v19, %v34_v18  ;;  %v35_v23 = vld [vmem:[%s1277_s4 + $0x30] sm:$0xff]  ;;  %v46_v24 = vld [vmem:[%s1278_s0] sm:$0xff]  ;;  %v38_v25 = vld [vmem:[%s1277_s4 + $0x48] sm:$0xff] }
   0x7   :  { %832 = vmatprep.subr.bf16.mxu1 %v799_v16  ;;  %v40_v26 = vld [vmem:[%s1277_s4 + $0x58] sm:$0xff]  ;;  %v1035_v27 = vpack.c.bf16 %v35_v23, %v33_v22  ;;  %v37_v28 = vld [vmem:[%s1277_s4 + $0x40] sm:$0xff]  ;;  %v39_v29 = vld [vmem:[%s1277_s4 + $0x50] sm:$0xff] }
   0x8   :  { %834 = vmatpush1.bf16.msra.mxu1 %v1014_v20  ;;  %v1043_v30 = vpack.c.bf16 %v40_v26, %v38_v25  ;;  %v42_v31 = vld [vmem:[%s1277_s4 + $0x68] sm:$0xff]  ;;  %v44_v32 = vld [vmem:[%s1277_s4 + $0x78] sm:$0xff]  ;;  %v1055_v33 = vpack.c.bf16 %v39_v29, %v37_v28  ;;  %v41_v35 = vld [vmem:[%s1277_s4 + $0x60] sm:$0xff] }
   0x9   :  { %798 = vmatpush1.bf16.msra.mxu0 %v797_v15  ;;  %836 = vmatprep.subr.bf16.mxu1 %v1016_v21  ;;  %v1058_v34 = vpack.c.bf16 %v44_v32, %v42_v31  ;;  %v43_v36 = vld [vmem:[%s1277_s4 + $0x70] sm:$0xff]  ;;  %v142_v38 = vld [vmem:[%s1279_s1] sm:$0x3] }
   0xa   :  { %800 = vmatprep.subr.bf16.mxu0 %v799_v16  ;;  %v1070_v37 = vpack.c.bf16 %v43_v36, %v41_v35  ;;  %v45_v44 = vld [vmem:[%s1281_s5] sm:$0x3] }
   0xb   :  { %v55_v45 = vld [vmem:[%s1280_s3] sm:$0x3]  ;;  %v1097_v47 = vrot.slane %v45_v44, %v59_v43  ;;  %v1104_v57 = vrot.slane %v45_v44, %v63_v56  ;;  %s923_s3 = smov 64  }
   0xc   :  { %745 = vmatmul.mubr.msk.f32.vlgmr.msra.gmra.mrb[0].mxu0 %vm67_vm0, %v46_v24  ;;  %838 = vmatpush1.bf16.msra.mxu1 %v1035_v27  ;;  %v60_v46 = vrot.slane %v55_v45, %v59_v43  ;;  %v64_v58 = vrot.slane %v55_v45, %v63_v56 }
   0xd   :  { %802 = vmatpush1.bf16.msra.mxu0 %v1014_v20  ;;  %222 = vmatprep.mubr.f32.mxu0 %v922_v3 }
   0xe   :  { %804 = vmatprep.subr.bf16.mxu0 %v1016_v21  ;;  %840 = vmatprep.subr.bf16.mxu1 %v1043_v30 }
  0x10   :  { %842 = vmatpush1.bf16.msra.mxu1 %v1055_v33 }
  0x11   :  { %806 = vmatpush1.bf16.msra.mxu0 %v1035_v27  ;;  %844 = vmatprep.subr.bf16.mxu1 %v1058_v34 }
  0x12   :  { %808 = vmatprep.subr.bf16.mxu0 %v1043_v30 }
  0x14   :  { %846 = vmatpush1.bf16.msra.mxu1 %v1070_v37 }
  0x15   :  { %810 = vmatpush1.bf16.msra.mxu0 %v1055_v33 }
  0x16   :  { %812 = vmatprep.subr.bf16.mxu0 %v1058_v34 }
  0x19   :  { %814 = vmatpush1.bf16.msra.mxu0 %v1070_v37 }
  0x1a   :  { %816 = vmatprep.subr.bf16.mxu0 %v799_v16 }
  0x1c   :  { %746 = vmatmul.mubr.msk.f32.vlgmr.msra.gmra.mrb[2].mxu0 %vm154_vm1, %v142_v38 }
  0x1d   :  { %818 = vmatpush1.bf16.msra.mxu0 %v1014_v20  ;;  %333 = vmatprep.mubr.f32.mxu0 %v922_v3 }
  0x1e   :  { %820 = vmatprep.subr.bf16.mxu0 %v1016_v21 }
  0x21   :  { %822 = vmatpush1.bf16.msra.mxu0 %v1035_v27 }
  0x22   :  { %824 = vmatprep.subr.bf16.mxu0 %v1043_v30 }
  0x25   :  { %826 = vmatpush1.bf16.msra.mxu0 %v1055_v33 }
  0x26   :  { %828 = vmatprep.subr.bf16.mxu0 %v1058_v34 }
  0x29   :  { %830 = vmatpush1.bf16.msra.mxu0 %v1070_v37 }
  0x2a   :  { %848 = vmatprep.subr.bf16.mxu0 %v799_v16 }
  0xdf   :  { %v137_v39 = vpop.f32.mrb[0].mxu0 }
  0xe0   :  { %v139_v41 = vpop.f32.mrb[1].mxu0  ;;  %v1099_v49 = vadd.f32 %v137_v39, %v60_v46 }
  0xe1   :  { %v1107_v61 = vadd.f32 %v139_v41, %v64_v58 }
  0xef   :  { %v224_v48 = vpop.f32.mrb[2].mxu0 }
  0xf0   :  { %v225_v50 = vadd.f32 %v224_v48, %v1097_v47  ;;  %v226_v51 = vpop.f32.mrb[3].mxu0  ;;  %v924_v48 = vmov 1983009808  }
  0xf1   :  { %v227_v59 = vadd.f32 %v226_v51, %v1104_v57 }
  0xf2   :  { %v229_v52 = vadd.f32 %v225_v50, %v1099_v49  ;;  %v252_v50 = vunpack.c.l.s4 %v924_v48 }
  0xf4   :  { %v747_v53 = vmul.f32 -1.442695, %v229_v52 }
  0xf6   :  { %898 = vpow2.f32 %v747_v53  ;;  %v253_v53 = vunpack.c.0.s8 %v252_v50  ;;  %v629_v50 = vld [vmem:[%s1282_s6 + $0x50] sm:$0xff] }
  0xf8   :  { %v1141_v56 = vsub.s32 %v253_v53, %v1088_v42  ;;  %v647_v53 = vld [vmem:[%s1282_s6 + $0xe0] sm:$0xff] }
 0x100   :  { %v899_v54 = vpop.eup %898 }
 0x101   :  { %v233_v55 = vadd.f32 1.0, %v899_v54 }
 0x103   :  { %900 = vrcp.f32 %v233_v55 }
 0x10d   :  { %v901_v60 = vpop.eup %900 }
 0x10e   :  { %v236_v62 = vmul.f32 %v901_v60, %v227_v59  ;;  %v239_v2 = vsub.f32 1.0, %v901_v60 }
 0x110   :  { %v237_v63 = vadd.f32 %v236_v62, %v1107_v61 }
 0x112   :  { %902 = vtanh.f32 %v237_v63 }
 0x11c   :  { %v903_v0 = vpop.eup %902 }
 0x11d   :  { %241 = vrot.lane.b32.xlu0 %v903_v0, %s923_s3 }
 0x121   :  { %245 = vrot.lane.b32.xlu0 %v142_v38, %s923_s3 }
 0x18f   :  { %v242_v1 = vpop.permute.xlu0 %241 }
 0x190   :  { %v244_v5 = vmul.f32 %v242_v1, %v239_v2 }
 0x193   :  { %v246_v4 = vpop.permute.xlu0 %245 }
 0x194   :  { %v248_v6 = vmul.f32 %v901_v60, %v246_v4 }
 0x196   :  { %v1112_v7 = vadd.f32 %v248_v6, %v244_v5 }
 0x198   :  { %265 = vrot.lane.b32.xlu1 %v1112_v7, %s923_s3  ;;  %264 = vst.msk [vmem:[#allocation2 + $0x2] sm:$0x3] %vm263_vm2, %v1112_v7  ;;  %v362_v18 = vrot.slane %v1112_v7, 6  ;;  %v257_v59 = vrot.slane %v1112_v7, %v1141_v56 }
 0x20a   :  { %v266_v8 = vpop.permute.xlu1 %265 }
 0x20b   :  { %748 = vmatmul.mubr.msk.f32.vlgmr.msra.gmra.mrb[4].mxu0 %vm154_vm1, %v266_v8 }
 0x20c   :  { %850 = vmatpush1.bf16.msra.mxu0 %v1014_v20  ;;  %569 = vmatprep.mubr.f32.mxu0 %v922_v3 }
 0x20d   :  { %852 = vmatprep.subr.bf16.mxu0 %v1016_v21 }
 0x210   :  { %854 = vmatpush1.bf16.msra.mxu0 %v1035_v27 }
 0x211   :  { %856 = vmatprep.subr.bf16.mxu0 %v1043_v30 }
 0x214   :  { %858 = vmatpush1.bf16.msra.mxu0 %v1055_v33 }
 0x215   :  { %860 = vmatprep.subr.bf16.mxu0 %v1058_v34 }
 0x218   :  { %862 = vmatpush1.bf16.msra.mxu0 %v1070_v37 }
 0x2de   :  { %v335_v9 = vpop.f32.mrb[4].mxu0 }
 0x2df   :  { %v336_v10 = vadd.f32 %v335_v9, %v1097_v47  ;;  %v337_v11 = vpop.f32.mrb[5].mxu0 }
 0x2e0   :  { %v338_v16 = vadd.f32 %v337_v11, %v1104_v57 }
 0x2e1   :  { %v341_v12 = vrot.slane %v336_v10, 6 }
 0x2e2   :  { %v351_v17 = vrot.slane %v338_v16, 6  ;;  %v619_v16 = vld [vmem:[%s1282_s6] sm:$0xff] }
 0x2e3   :  { %v343_v13 = vadd.f32 %v341_v12, %v1099_v49 }
 0x2e5   :  { %v749_v3 = vmul.f32 -1.442695, %v343_v13 }
 0x2e7   :  { %904 = vpow2.f32 %v749_v3 }
 0x2f1   :  { %v905_v14 = vpop.eup %904 }
 0x2f2   :  { %v347_v15 = vadd.f32 1.0, %v905_v14 }
 0x2f4   :  { %906 = vrcp.f32 %v347_v15 }
 0x2fe   :  { %v907_v19 = vpop.eup %906 }
 0x2ff   :  { %v353_v20 = vmul.f32 %v907_v19, %v351_v17  ;;  %v364_v21 = vmul.f32 %v907_v19, %v362_v18  ;;  %v356_v24 = vsub.f32 1.0, %v907_v19  ;;  %v620_v19 = vld [vmem:[%s1282_s6 + $0x8] sm:$0xff] }
 0x301   :  { %v354_v22 = vadd.f32 %v353_v20, %v1107_v61  ;;  %v638_v20 = vld [vmem:[%s1282_s6 + $0x98] sm:$0xff] }
 0x303   :  { %908 = vtanh.f32 %v354_v22 }
 0x30d   :  { %v909_v23 = vpop.eup %908 }
 0x30e   :  { %358 = vrot.lane.b32.xlu1 %v909_v23, %s923_s3  ;;  %v621_v23 = vld [vmem:[%s1282_s6 + $0x10] sm:$0xff] }
 0x380   :  { %v359_v25 = vpop.permute.xlu1 %358 }
 0x381   :  { %v361_v26 = vmul.f32 %v359_v25, %v356_v24  ;;  %v622_v24 = vld [vmem:[%s1282_s6 + $0x18] sm:$0xff]  ;;  %v639_v25 = vld [vmem:[%s1282_s6 + $0xa0] sm:$0xff] }
 0x383   :  { %v365_v27 = vadd.f32 %v364_v21, %v361_v26  ;;  %v865_v21 = vpack.c.bf16 %v620_v19, %v619_v16  ;;  %v640_v26 = vld [vmem:[%s1282_s6 + $0xa8] sm:$0xff] }
 0x385   :  { %v383_v28 = vrot.slane %v365_v27, 2  ;;  %v481_v40 = vrot.slane %v365_v27, 6  ;;  %v373_v63 = vrot.slane %v365_v27, %v1141_v56  ;;  %v869_v27 = vpack.c.bf16 %v622_v24, %v621_v23 }
 0x387   :  { %384 = vrot.lane.b32.xlu0 %v383_v28, %s923_s3  ;;  %v374_v42 = vcombine.high %v373_v63, %v373_v63  ;;  %v871_v28 = vpack.c.bf16 %v640_v26, %v639_v25  ;;  %v650_v63 = vld [vmem:[%s1282_s6 + $0xf8] sm:$0xff] }
 0x3f9   :  { %v385_v29 = vpop.permute.xlu0 %384 }
 0x3fa   :  { %750 = vmatmul.mubr.msk.f32.vlgmr.msra.gmra.mrb[0].mxu1 %vm154_vm1, %v385_v29  ;;  %v623_v29 = vld [vmem:[%s1282_s6 + $0x20] sm:$0xff] }
 0x4cd   :  { %v454_v30 = vpop.f32.mrb[0].mxu1 }
 0x4ce   :  { %v455_v31 = vadd.f32 %v454_v30, %v1097_v47  ;;  %v456_v32 = vpop.f32.mrb[1].mxu1  ;;  %v624_v30 = vld [vmem:[%s1282_s6 + $0x28] sm:$0xff] }
 0x4cf   :  { %v457_v38 = vadd.f32 %v456_v32, %v1104_v57  ;;  %v642_v32 = vld [vmem:[%s1282_s6 + $0xb8] sm:$0xff] }
 0x4d0   :  { %v460_v33 = vrot.slane %v455_v31, 4  ;;  %v641_v31 = vld [vmem:[%s1282_s6 + $0xb0] sm:$0xff] }
 0x4d1   :  { %v470_v39 = vrot.slane %v457_v38, 4  ;;  %v644_v38 = vld [vmem:[%s1282_s6 + $0xc8] sm:$0xff] }
 0x4d2   :  { %v462_v34 = vadd.f32 %v460_v33, %v1099_v49  ;;  %v873_v33 = vpack.c.bf16 %v624_v30, %v623_v29 }
 0x4d4   :  { %v751_v35 = vmul.f32 -1.442695, %v462_v34  ;;  %v875_v34 = vpack.c.bf16 %v642_v32, %v641_v31 }
 0x4d6   :  { %910 = vpow2.f32 %v751_v35  ;;  %v625_v35 = vld [vmem:[%s1282_s6 + $0x30] sm:$0xff] }
 0x4e0   :  { %v911_v36 = vpop.eup %910 }
 0x4e1   :  { %v466_v37 = vadd.f32 1.0, %v911_v36  ;;  %v626_v36 = vld [vmem:[%s1282_s6 + $0x38] sm:$0xff] }
 0x4e3   :  { %912 = vrcp.f32 %v466_v37  ;;  %v643_v37 = vld [vmem:[%s1282_s6 + $0xc0] sm:$0xff] }
 0x4ed   :  { %v913_v41 = vpop.eup %912 }
 0x4ee   :  { %v472_v43 = vmul.f32 %v913_v41, %v470_v39  ;;  %v483_v44 = vmul.f32 %v913_v41, %v481_v40  ;;  %v475_v51 = vsub.f32 1.0, %v913_v41  ;;  %v877_v39 = vpack.c.bf16 %v626_v36, %v625_v35  ;;  %v627_v41 = vld [vmem:[%s1282_s6 + $0x40] sm:$0xff] }
 0x4ef   :  { %v879_v40 = vpack.c.bf16 %v644_v38, %v643_v37 }
 0x4f0   :  { %v473_v45 = vadd.f32 %v472_v43, %v1107_v61  ;;  %v628_v43 = vld [vmem:[%s1282_s6 + $0x48] sm:$0xff] }
 0x4f2   :  { %914 = vtanh.f32 %v473_v45  ;;  %v646_v45 = vld [vmem:[%s1282_s6 + $0xd8] sm:$0xff] }
 0x4fc   :  { %v915_v46 = vpop.eup %914 }
 0x4fd   :  { %477 = vrot.lane.b32.xlu1 %v915_v46, %s923_s3  ;;  %v881_v46 = vpack.c.bf16 %v628_v43, %v627_v41 }
 0x56f   :  { %v478_v52 = vpop.permute.xlu1 %477 }
 0x570   :  { %v480_v54 = vmul.f32 %v478_v52, %v475_v51  ;;  %v630_v51 = vld [vmem:[%s1282_s6 + $0x58] sm:$0xff] }
 0x571   :  { %v885_v52 = vpack.c.bf16 %v630_v51, %v629_v50 }
 0x572   :  { %v484_v55 = vadd.f32 %v483_v44, %v480_v54  ;;  %v645_v44 = vld [vmem:[%s1282_s6 + $0xd0] sm:$0xff]  ;;  %v648_v54 = vld [vmem:[%s1282_s6 + $0xe8] sm:$0xff] }
 0x573   :  { %v883_v48 = vpack.c.bf16 %v646_v45, %v645_v44 }
 0x574   :  { %v500_v58 = vrot.slane %v484_v55, 4  ;;  %v486_v60 = vcombine.high %v484_v55, %v484_v55  ;;  %v598_v13 = vrot.slane %v484_v55, 6  ;;  %v631_v55 = vld [vmem:[%s1282_s6 + $0x60] sm:$0xff] }
 0x576   :  { %501 = vrot.lane.b32.xlu0 %v500_v58, %s923_s3  ;;  %v493_v62 = vrot.slane %v486_v60, %v1141_v56  ;;  %v632_v60 = vld [vmem:[%s1282_s6 + $0x68] sm:$0xff] }
 0x57a   :  { %258 = vrot.lane.b32.xlu0 %v257_v59, %s923_s3  ;;  %v887_v59 = vpack.c.bf16 %v648_v54, %v647_v53 }
 0x57e   :  { %494 = vrot.lane.b32.xlu0 %v493_v62, %s923_s3 }
 0x5e8   :  { %v502_v0 = vpop.permute.xlu0 %501 }
 0x5e9   :  { %752 = vmatmul.mubr.msk.f32.vlgmr.msra.gmra.mrb[6].mxu0 %vm154_vm1, %v502_v0 }
 0x5ec   :  { %v259_v1 = vpop.permute.xlu0 %258 }
 0x5ed   :  { %262 = vst.msk [vmem:[#allocation2] sm:$0x3] %vm261_vm3, %v259_v1 }
 0x5ee   :  { %377 = vst.msk [vmem:[#allocation2] sm:$0x3] %vm376_vm4, %v374_v42 }
 0x5ef   :  { %499 = vst.msk [vmem:[#allocation2] sm:$0x3] %vm263_vm2, %v493_v62  ;;  %v649_v62 = vld [vmem:[%s1282_s6 + $0xf0] sm:$0xff] }
 0x5f0   :  { %v891_v1 = vpack.c.bf16 %v650_v63, %v649_v62 }
 0x6bc   :  { %v571_v2 = vpop.f32.mrb[6].mxu0 }
 0x6bd   :  { %v572_v4 = vadd.f32 %v571_v2, %v1097_v47  ;;  %v573_v5 = vpop.f32.mrb[7].mxu0  ;;  %v633_v2 = vld [vmem:[%s1282_s6 + $0x70] sm:$0xff] }
 0x6be   :  { %v574_v11 = vadd.f32 %v573_v5, %v1104_v57  ;;  %v636_v57 = vld [vmem:[%s1282_s6 + $0x88] sm:$0xff] }
 0x6bf   :  { %v577_v6 = vrot.slane %v572_v4, 2  ;;  %v634_v4 = vld [vmem:[%s1282_s6 + $0x78] sm:$0xff] }
 0x6c0   :  { %v587_v12 = vrot.slane %v574_v11, 2 }
 0x6c1   :  { %v579_v7 = vadd.f32 %v577_v6, %v1099_v49  ;;  %v635_v49 = vld [vmem:[%s1282_s6 + $0x80] sm:$0xff]  ;;  %v893_v6 = vpack.c.bf16 %v634_v4, %v633_v2 }
 0x6c2   :  { %v863_v18 = vpack.c.bf16 %v636_v57, %v635_v49 }
 0x6c3   :  { %v753_v8 = vmul.f32 -1.442695, %v579_v7 }
 0x6c4   :  { %864 = vmatprep.subr.bf16.mxu1 %v863_v18 }
 0x6c5   :  { %916 = vpow2.f32 %v753_v8  ;;  %866 = vmatpush3.bf16.msra.mxu1 %v865_v21 }
 0x6cf   :  { %v917_v9 = vpop.eup %916 }
 0x6d0   :  { %v583_v10 = vadd.f32 1.0, %v917_v9  ;;  %v495_v9 = vpop.permute.xlu0 %494 }
 0x6d2   :  { %918 = vrcp.f32 %v583_v10 }
 0x6dc   :  { %v1157_v3 = vpop.eup %918 }
 0x6dd   :  { %v589_v14 = vmul.f32 %v1157_v3, %v587_v12  ;;  %v1161_v15 = vmul.f32 %v1157_v3, %v598_v13  ;;  %v592_v58 = vsub.f32 1.0, %v1157_v3 }
 0x6df   :  { %v590_v47 = vadd.f32 %v589_v14, %v1107_v61  ;;  %v637_v61 = vld [vmem:[%s1282_s6 + $0x90] sm:$0xff] }
 0x6e0   :  { %v867_v22 = vpack.c.bf16 %v638_v20, %v637_v61 }
 0x6e1   :  { %920 = vtanh.f32 %v590_v47  ;;  %v754_v47 = vld [vmem:[%s1283_s7] ss:$0 sm:$0xff] }
 0x6e2   :  { %868 = vmatprep.subr.bf16.mxu1 %v867_v22 }
 0x6e3   :  { %870 = vmatpush3.bf16.msra.mxu1 %v869_v27 }
 0x6e4   :  { %872 = vmatprep.subr.bf16.mxu1 %v871_v28 }
 0x6e7   :  { %874 = vmatpush3.bf16.msra.mxu1 %v873_v33 }
 0x6e8   :  { %876 = vmatprep.subr.bf16.mxu1 %v875_v34 }
 0x6eb   :  { %v921_v17 = vpop.eup %920  ;;  %878 = vmatpush3.bf16.msra.mxu1 %v877_v39 }
 0x6ec   :  { %594 = vrot.lane.b32.xlu1 %v921_v17, %s923_s3  ;;  %880 = vmatprep.subr.bf16.mxu1 %v879_v40 }
 0x6ef   :  { %882 = vmatpush3.bf16.msra.mxu1 %v881_v46 }
 0x6f0   :  { %378 = vrot.lane.b32.xlu1 %v374_v42, %s923_s3  ;;  %884 = vmatprep.subr.bf16.mxu1 %v883_v48  ;;  %v889_v42 = vpack.c.bf16 %v632_v60, %v631_v55 }
 0x6f3   :  { %886 = vmatpush3.bf16.msra.mxu1 %v885_v52 }
 0x6f4   :  { %888 = vmatprep.subr.bf16.mxu1 %v887_v59 }
 0x6f7   :  { %890 = vmatpush3.bf16.msra.mxu1 %v889_v42 }
 0x6f8   :  { %892 = vmatprep.subr.bf16.mxu1 %v891_v1 }
 0x6fb   :  { %894 = vmatpush3.bf16.msra.mxu1 %v893_v6 }
 0x75e   :  { %v595_v0 = vpop.permute.xlu1 %594 }
 0x75f   :  { %v597_v5 = vmul.f32 %v595_v0, %v592_v58 }
 0x761   :  { %v601_v7 = vadd.f32 %v1161_v15, %v597_v5 }
 0x762   :  { %v379_v8 = vpop.permute.xlu1 %378 }
 0x763   :  { %v603_v10 = vcombine.high %v601_v7, %v601_v7  ;;  %382 = vst.msk [vmem:[#allocation2 + $0x2] sm:$0x3] %vm381_vm5, %v379_v8 }
 0x764   :  { %497 = vst.msk [vmem:[#allocation2 + $0x2] sm:$0x3] %vm261_vm3, %v495_v9 }
 0x765   :  { %v610_v11 = vrot.slane %v603_v10, %v1141_v56 }
 0x767   :  { %v611_v12 = vcombine.high %v610_v11, %v610_v11 }
 0x769   :  { %614 = vrot.lane.b32.xlu1 %v611_v12, %s923_s3  ;;  %613 = vst.msk [vmem:[#allocation2 + $0x2] sm:$0x3] %vm376_vm4, %v611_v12 }
 0x7db   :  { %v615_v13 = vpop.permute.xlu1 %614 }
 0x7dc   :  { %617 = vst.msk [vmem:[#allocation2] sm:$0x3] %vm381_vm5, %v615_v13 }
 0x7e3   :  { %v755_v3 = vld.sshfl [vmem:[#allocation2] sm:$0x33 pattern:$0x76325410] }
 0x7e4   :  { %v666_v14 = vcombine.high %v755_v3, %v755_v3 }
 0x7e6   :  { %733 = vmatprep.mubr.f32.mxu1 %v666_v14 }
 0x7e7   :  { %734 = vmatmul.mubr.f32.vlgmr.msra.gmra.mrb[2].mxu1 %v755_v3 }
 0x8ba   :  { %v788_v15 = vpop.f32.mrb[2].mxu1 }
 0x8bb   :  { %v789_v49 = vpop.f32.mrb[3].mxu1 }
 0x8bc   :  { %v790_v57 = vadd.f32 %v789_v49, %v788_v15 }
 0x8be   :  { %v736_v56 = vadd.f32 %v790_v57, %v754_v47 }
 0x8c0   :  { %740 = vst.msk [vmem:[%s1284_s8] sm:$0x3] %vm739_vm6, %v736_v56 }

</bundles_post_ra>
